<compile_context>
chip_gen: v5e
topology: v5e:2x2
jax: 0.10.0
libtpu: 0.0.40
codegen_flags: <defaults>
</compile_context>

<pallas_src>
import jax
import jax.numpy as jnp
from jax.experimental import pallas as pl
from jax.experimental.pallas import tpu as pltpu


def _round_up(x, m):
    return ((x + m - 1) // m) * m


def vae_decoder_kernel(x_ref, w1_ref, b1_ref, w2_ref, b2_ref, o_ref):
    # fc1: [tb, L](bf16) @ [L, H](bf16) -> f32 accumulation on the MXU.
    x = x_ref[...].astype(jnp.bfloat16)
    h = jnp.dot(x, w1_ref[...], preferred_element_type=jnp.float32)
    # Bias + ReLU kept in f32 (v5e has no bf16 VPU).
    h = jnp.maximum(h + b1_ref[...], 0.0)
    # fc2: bf16 MXU operands, f32 accumulation.
    y = jnp.dot(h.astype(jnp.bfloat16), w2_ref[...],
                preferred_element_type=jnp.float32)
    y = y + b2_ref[...]
    # Sigmoid goes to the EUP; lane-dense [tb, O] store (masked on the ragged
    # last block, whose out-of-bounds rows are simply dropped).
    o_ref[...] = jax.nn.sigmoid(y).astype(o_ref.dtype)


def prepare_vae_decoder_params(w1, b1, w2, b2):
    """One-time conversion: bf16 MXU weights, (1, N) f32 biases.

    Do this once at model-load time so per-call invocations pay no extra XLA
    cast/reshape kernels or weight HBM passes."""
    return (w1.astype(jnp.bfloat16),
            b1.reshape(1, -1).astype(jnp.float32),
            w2.astype(jnp.bfloat16),
            b2.reshape(1, -1).astype(jnp.float32))


def vae_decoder_pallas(x, w1_bf16, b1_row, w2_bf16, b2_row, *, tb=1024,
                       out_dtype=jnp.float32):
    """x: [B, latent] f32 (or bf16), w1_bf16: [latent, hidden] bf16,
       b1_row: [1, hidden] f32, w2_bf16: [hidden, out] bf16,
       b2_row: [1, out] f32  ->  [B, out] out_dtype."""
    B, L = x.shape
    L_w1, H = w1_bf16.shape
    H_w2, O = w2_bf16.shape
    assert L == L_w1 and H == H_w2
    assert b1_row.shape == (1, H) and b2_row.shape == (1, O)

    if B <= tb:
        # Whole batch in one grid step.  Block rows == full array dim, so no
        # (8,128) divisibility requirement and no batch padding is needed.
        tb_eff = B
        n_steps = 1
    else:
        # Balanced tiles, no batch padding.  Prefer an even step count so the
        # "parallel" batch axis load-balances across v7x's two TensorCores
        # (no-op on v5e/v6e); 128-row granule keeps the MXU rows full.
        n_steps = pl.cdiv(B, tb)
        if n_steps % 2 == 1:
            n_steps += 1
        tb_eff = _round_up(pl.cdiv(B, n_steps), 128)
        n_steps = pl.cdiv(B, tb_eff)  # ragged last block is masked on store

    grid = (n_steps,)
    # TODO(synk): for production-size H/O, single-buffer the resident weight
    # blocks (pipeline_mode=pl.Buffered(1)) and set vmem_limit_bytes so large
    # batch tiles still fit v7x's 64 MiB VMEM; negligible at these sizes.
    out = pl.pallas_call(
        vae_decoder_kernel,
        out_shape=jax.ShapeDtypeStruct((B, O), out_dtype),
        grid_spec=pl.GridSpec(
            grid=grid,
            in_specs=[
                pl.BlockSpec((tb_eff, L), lambda i: (i, 0)),   # x tile
                pl.BlockSpec((L, H), lambda i: (0, 0)),        # w1 (resident)
                pl.BlockSpec((1, H), lambda i: (0, 0)),        # b1
                pl.BlockSpec((H, O), lambda i: (0, 0)),        # w2 (resident)
                pl.BlockSpec((1, O), lambda i: (0, 0)),        # b2
            ],
            out_specs=pl.BlockSpec((tb_eff, O), lambda i: (i, 0)),
        ),
        compiler_params=pltpu.CompilerParams(
            dimension_semantics=("parallel",),
        ),
    )(x, w1_bf16, b1_row, w2_bf16, b2_row)
    return out


def vae_decoder_ref(x, w1, b1, w2, b2, *, cast_bf16=True):
    if cast_bf16:
        xx, ww1, ww2 = (a.astype(jnp.bfloat16) for a in (x, w1, w2))
    else:
        xx, ww1, ww2 = x, w1, w2
    h = jnp.dot(xx, ww1, preferred_element_type=jnp.float32) + b1
    h = jnp.maximum(h, 0.0)
    h2 = h.astype(jnp.bfloat16) if cast_bf16 else h
    y = jnp.dot(h2, ww2, preferred_element_type=jnp.float32) + b2
    return jax.nn.sigmoid(y)


if __name__ == "__main__":
    latent_size = 64
    hidden_size = 256
    output_size = 128

    key = jax.random.PRNGKey(0)
    kx, kw1, kb1, kw2, kb2 = jax.random.split(key, 5)

    # Deterministic PyTorch nn.Linear-style uniform init.
    lim1 = 1.0 / (latent_size ** 0.5)
    w1 = jax.random.uniform(kw1, (latent_size, hidden_size), jnp.float32, -lim1, lim1)
    b1 = jax.random.uniform(kb1, (hidden_size,), jnp.float32, -lim1, lim1)
    lim2 = 1.0 / (hidden_size ** 0.5)
    w2 = jax.random.uniform(kw2, (hidden_size, output_size), jnp.float32, -lim2, lim2)
    b2 = jax.random.uniform(kb2, (output_size,), jnp.float32, -lim2, lim2)

    # One-time param prep (bf16 weights, row-shaped f32 biases).
    params = prepare_vae_decoder_params(w1, b1, w2, b2)

    # Small batch: single grid step, block == full batch, no padding anywhere.
    batch = 8
    x = jax.random.normal(kx, (batch, latent_size), dtype=jnp.float32)
    out = jax.block_until_ready(vae_decoder_pallas(x, *params))
    assert out.shape == (batch, output_size) and out.dtype == jnp.float32
    ref_bf16 = vae_decoder_ref(x, w1, b1, w2, b2, cast_bf16=True)
    ref_f32 = vae_decoder_ref(x, w1, b1, w2, b2, cast_bf16=False)
    assert jnp.allclose(out, ref_bf16, atol=2e-3, rtol=2e-3)
    assert jnp.allclose(out, ref_f32, atol=2e-2, rtol=2e-2)

    # Mid batch with the default tb=1024: still one unpadded tile (rows == B).
    big_batch = 300
    xb = jax.random.normal(jax.random.PRNGKey(1), (big_batch, latent_size),
                           dtype=jnp.float32)
    outb = jax.block_until_ready(vae_decoder_pallas(xb, *params))
    refb = vae_decoder_ref(xb, w1, b1, w2, b2, cast_bf16=True)
    assert outb.shape == (big_batch, output_size) and outb.dtype == jnp.float32
    assert jnp.allclose(outb, refb, atol=2e-3, rtol=2e-3)

    # Force the multi-step grid path with a ragged (masked) last block.
    outs = jax.block_until_ready(vae_decoder_pallas(xb, *params, tb=128))
    assert outs.shape == (big_batch, output_size)
    assert jnp.allclose(outs, refb, atol=2e-3, rtol=2e-3)

    # Optional bf16 output (halves output HBM bytes for tolerant consumers).
    outh = jax.block_until_ready(
        vae_decoder_pallas(xb, *params, out_dtype=jnp.bfloat16))
    assert outh.dtype == jnp.bfloat16
    assert jnp.allclose(outh.astype(jnp.float32), refb, atol=8e-3, rtol=8e-3)

    print("KERNEL_OK")
</pallas_src>

<mosaic_0001>
module attributes {stable_mosaic.version = 11 : i64} {
  func.func @vae_decoder_kernel(%arg0: i32, %arg1: memref<8x64xf32, #tpu.memory_space<vmem>>, %arg2: memref<64x256xbf16, #tpu.memory_space<vmem>>, %arg3: memref<1x256xf32, #tpu.memory_space<vmem>>, %arg4: memref<256x128xbf16, #tpu.memory_space<vmem>>, %arg5: memref<1x128xf32, #tpu.memory_space<vmem>>, %arg6: memref<8x128xf32, #tpu.memory_space<vmem>>) attributes {dimension_semantics = [#tpu.dimension_semantics<parallel>], iteration_bounds = array<i64: 1>, scalar_prefetch = 0 : i64, scratch_operands = 0 : i64, tpu.core_type = #tpu.core_type<tc>, window_params = [{transform_indices = @transform_0, window_bounds = array<i64: 8, 64>}, {pipeline_mode = #tpu.pipeline_mode<synchronous>, transform_indices = @transform_1, window_bounds = array<i64: 64, 256>}, {pipeline_mode = #tpu.pipeline_mode<synchronous>, transform_indices = @transform_2, window_bounds = array<i64: 1, 256>}, {pipeline_mode = #tpu.pipeline_mode<synchronous>, transform_indices = @transform_3, window_bounds = array<i64: 256, 128>}, {pipeline_mode = #tpu.pipeline_mode<synchronous>, transform_indices = @transform_4, window_bounds = array<i64: 1, 128>}, {transform_indices = @transform_5, window_bounds = array<i64: 8, 128>}]} {
    %c0 = arith.constant 0 : index
    %c0_0 = arith.constant 0 : index
    %0 = vector.load %arg1[%c0, %c0_0] : memref<8x64xf32, #tpu.memory_space<vmem>>, vector<8x64xf32>
    %1 = arith.truncf %0 : vector<8x64xf32> to vector<8x64xbf16>
    %c0_1 = arith.constant 0 : index
    %c0_2 = arith.constant 0 : index
    %2 = vector.load %arg2[%c0_1, %c0_2] : memref<64x256xbf16, #tpu.memory_space<vmem>>, vector<64x256xbf16>
    %cst = arith.constant dense<0.000000e+00> : vector<8x256xf32>
    %3 = tpu.matmul %1, %2, %cst {dimension_numbers = #tpu.dot_dimension_numbers<[1], [0], [0], [1], [0, 0, 1, 1], [], []>} : vector<8x64xbf16>, vector<64x256xbf16>, vector<8x256xf32> -> vector<8x256xf32>
    %c0_3 = arith.constant 0 : index
    %c0_4 = arith.constant 0 : index
    %4 = vector.load %arg3[%c0_3, %c0_4] : memref<1x256xf32, #tpu.memory_space<vmem>>, vector<1x256xf32>
    %5 = vector.broadcast %4 : vector<1x256xf32> to vector<8x256xf32>
    %6 = arith.addf %3, %5 : vector<8x256xf32>
    %cst_5 = arith.constant 0.000000e+00 : f32
    %7 = vector.broadcast %cst_5 : f32 to vector<8x256xf32>
    %8 = arith.maximumf %6, %7 : vector<8x256xf32>
    %9 = arith.truncf %8 : vector<8x256xf32> to vector<8x256xbf16>
    %c0_6 = arith.constant 0 : index
    %c0_7 = arith.constant 0 : index
    %10 = vector.load %arg4[%c0_6, %c0_7] : memref<256x128xbf16, #tpu.memory_space<vmem>>, vector<256x128xbf16>
    %cst_8 = arith.constant dense<0.000000e+00> : vector<8x128xf32>
    %11 = tpu.matmul %9, %10, %cst_8 {dimension_numbers = #tpu.dot_dimension_numbers<[1], [0], [0], [1], [0, 0, 1, 1], [], []>} : vector<8x256xbf16>, vector<256x128xbf16>, vector<8x128xf32> -> vector<8x128xf32>
    %c0_9 = arith.constant 0 : index
    %c0_10 = arith.constant 0 : index
    %12 = vector.load %arg5[%c0_9, %c0_10] : memref<1x128xf32, #tpu.memory_space<vmem>>, vector<1x128xf32>
    %13 = vector.broadcast %12 : vector<1x128xf32> to vector<8x128xf32>
    %14 = arith.addf %11, %13 : vector<8x128xf32>
    %15 = arith.negf %14 : vector<8x128xf32>
    %16 = math.exp %15 : vector<8x128xf32>
    %cst_11 = arith.constant 1.000000e+00 : f32
    %17 = vector.broadcast %cst_11 : f32 to vector<8x128xf32>
    %18 = arith.addf %17, %16 : vector<8x128xf32>
    %19 = arith.divf %17, %18 : vector<8x128xf32>
    %c0_12 = arith.constant 0 : index
    %c0_13 = arith.constant 0 : index
    %20 = vector.load %arg6[%c0_12, %c0_13] : memref<8x128xf32, #tpu.memory_space<vmem>>, vector<8x128xf32>
    tpu.vector_store %arg6[%c0_12, %c0_13], %19 {strides = array<i32>} : memref<8x128xf32, #tpu.memory_space<vmem>>, vector<8x128xf32>,
    return
  }
  func.func @transform_0(%arg0: i32) -> (i32, i32) {
    %c0_i32 = arith.constant 0 : i32
    %c0_i32_0 = arith.constant 0 : i32
    return %arg0, %c0_i32 : i32, i32
  }
  func.func @transform_1(%arg0: i32) -> (i32, i32) {
    %c0_i32 = arith.constant 0 : i32
    %c0_i32_0 = arith.constant 0 : i32
    %c0_i32_1 = arith.constant 0 : i32
    return %c0_i32, %c0_i32_0 : i32, i32
  }
  func.func @transform_2(%arg0: i32) -> (i32, i32) {
    %c0_i32 = arith.constant 0 : i32
    %c0_i32_0 = arith.constant 0 : i32
    %c0_i32_1 = arith.constant 0 : i32
    return %c0_i32, %c0_i32_0 : i32, i32
  }
  func.func @transform_3(%arg0: i32) -> (i32, i32) {
    %c0_i32 = arith.constant 0 : i32
    %c0_i32_0 = arith.constant 0 : i32
    %c0_i32_1 = arith.constant 0 : i32
    return %c0_i32, %c0_i32_0 : i32, i32
  }
  func.func @transform_4(%arg0: i32) -> (i32, i32) {
    %c0_i32 = arith.constant 0 : i32
    %c0_i32_0 = arith.constant 0 : i32
    %c0_i32_1 = arith.constant 0 : i32
    return %c0_i32, %c0_i32_0 : i32, i32
  }
  func.func @transform_5(%arg0: i32) -> (i32, i32) {
    %c0_i32 = arith.constant 0 : i32
    %c0_i32_0 = arith.constant 0 : i32
    return %arg0, %c0_i32 : i32, i32
  }
}

</mosaic_0001>

<bundles_post_ra>
// kernel: tpu_custom_call.1
= control target key start
LH: loop header
LB: loop body
LE: loop exit
PB: predicated region body
PF: predicated region fallthrough
CT: control target
= control target key end

     0   :  { %10 = vsyncpa [#allocation3], 0  ;;  %s690_s0 = inlined_call_operand.hbm [shape: f32[8,64], index: 0, kind: input, shape index: {}]   ;;  %s691_s1 = inlined_call_operand.hbm [shape: bf16[64,256], index: 1, kind: input, shape index: {}]   ;;  %s692_s2 = inlined_call_operand.hbm [shape: f32[1,256], index: 2, kind: input, shape index: {}]   ;;  %s693_s3 = inlined_call_operand.hbm [shape: bf16[256,128], index: 3, kind: input, shape index: {}]   ;;  %s694_s4 = inlined_call_operand.vmem [shape: f32[1,128], index: 4, kind: input, shape index: {}]   ;;  %s695_s5 = inlined_call_operand.hbm [shape: f32[8,128], index: 5, kind: output, shape index: {}]  }
   0x1   :  { %11 = vsyncpa [#allocation6], 0 }
   0x2   :  { %12 = vsyncpa [#allocation9], 0  ;;  %s29_s20 = sshll.u32 %s691_s1, 4  ;;  %s30_s20 = int_to_ptr.hbm [resolvable:$true] %s29_s20 }
   0x3   :  { %13 = vsyncpa [#allocation4], 0  ;;  %s633_s21 = smov [#allocation5]   ;;  %s19_s25 = sshll.u32 %s690_s0, 4  ;;  %s20_s25 = int_to_ptr.hbm [resolvable:$true] %s19_s25 }
   0x4   :  { %s31_s22 = sshll.u32 %s633_s21, 4  ;;  %s634_s26 = smov 128   ;;  %s32_s22 = int_to_ptr.vmem [resolvable:$true] %s31_s22 }
   0x5   :  { %s635_s27 = smov 8   ;;  %s636_s28 = smov [#allocation2]  }
   0x6   :  { %37 = dma.hbm_to_vmem [thread:$0]  %s30_s20, 1024, %s32_s22, [#allocation6], %s634_s26, %s634_s26, %s635_s27  }
   0x7   :  { %s21_s29 = sshll.u32 %s636_s28, 4  ;;  %s43_s7 = sshll.u32 %s692_s2, 4  ;;  %s22_s29 = int_to_ptr.vmem [resolvable:$true] %s21_s29  ;;  %s44_s7 = int_to_ptr.hbm [resolvable:$true] %s43_s7 }
   0x8   :  { %24 = dma.hbm_to_vmem [thread:$0]  %s20_s25, 128, %s22_s29, [#allocation3]  }
   0x9   :  { %s53_s9 = sshll.u32 %s693_s3, 4  ;;  %s637_s10 = smov [#allocation7]   ;;  %s54_s9 = int_to_ptr.hbm [resolvable:$true] %s53_s9 }
   0xa   :  { %s45_s11 = sshll.u32 %s637_s10, 4  ;;  %s638_s0 = smov [#allocation8]   ;;  %s46_s11 = int_to_ptr.vmem [resolvable:$true] %s45_s11 }
   0xb   :  { %48 = dma.hbm_to_vmem [thread:$0]  %s44_s7, 32, %s46_s11, [#allocation6]  }
   0xc   :  { %s55_s12 = sshll.u32 %s638_s0, 4  ;;  %s639_s13 = smov 64   ;;  %s56_s12 = int_to_ptr.vmem [resolvable:$true] %s55_s12 }
   0xd   :  { %s640_s14 = smov 4  }
   0xe   :  { %61 = dma.hbm_to_vmem [thread:$0]  %s54_s9, 2048, %s56_s12, [#allocation9], %s639_s13, %s639_s13, %s640_s14  }
   0xf   :  { %625 = dma.done.wait [#allocation3], 128  }
  0x10   :  { %626 = vsyncadd [#allocation3], 4294967168 }
  0x11   :  { %627 = dma.done.wait [#allocation6], 1056  }
  0x12   :  { %628 = vsyncadd [#allocation6], 4294966240 }
  0x13   :  { %629 = dma.done.wait [#allocation9], 2048  }
  0x14   :  { %630 = vsyncadd [#allocation9], 4294965248  ;;  %v394_v0 = vld [vmem:[#allocation5 + $0x30] sm:$0xf]  ;;  %v474_v1 = vld [vmem:[#allocation5 + $0x34] sm:$0xf0] }
  0x15   :  { %v473_v2 = vld [vmem:[#allocation5 + $0x34] sm:$0xf]  ;;  %v395_v3 = vor.u32 %v474_v1, %v394_v0  ;;  %v396_v4 = vld [vmem:[#allocation5 + $0x38] sm:$0xf0]  ;;  %v386_v5 = vld [vmem:[#allocation5 + $0x20] sm:$0xf] }
  0x16   :  { %v472_v6 = vld [vmem:[#allocation5 + $0x24] sm:$0xf0]  ;;  %v399_v7 = vor.u32 %v473_v2, %v396_v4  ;;  %v471_v8 = vld [vmem:[#allocation5 + $0x24] sm:$0xf]  ;;  %v388_v9 = vld [vmem:[#allocation5 + $0x28] sm:$0xf0] }
  0x17   :  { %145 = vmatpush.bf16.msra.mxu0 %v395_v3  ;;  %v387_v10 = vor.u32 %v472_v6, %v386_v5  ;;  %v391_v11 = vor.u32 %v471_v8, %v388_v9  ;;  %v378_v12 = vld [vmem:[#allocation5 + $0x10] sm:$0xf]  ;;  %v470_v13 = vld [vmem:[#allocation5 + $0x14] sm:$0xf0]  ;;  %v469_v14 = vld [vmem:[#allocation5 + $0x14] sm:$0xf] }
  0x18   :  { %158 = vmatpush.bf16.msra.mxu1 %v399_v7  ;;  %v380_v15 = vld [vmem:[#allocation5 + $0x18] sm:$0xf0]  ;;  %v379_v18 = vor.u32 %v470_v13, %v378_v12  ;;  %v481_v19 = vld [vmem:[#allocation8 + $0x30] sm:$0xff]  ;;  %v370_v21 = vld [vmem:[#allocation5] sm:$0xf]  ;;  %vm137_vm0 = vcmask 523264  }
  0x19   :  { %v482_v16 = vld [vmem:[#allocation8 + $0x38] sm:$0xff]  ;;  %v383_v20 = vor.u32 %v469_v14, %v380_v15  ;;  %v468_v22 = vld [vmem:[#allocation5 + $0x4] sm:$0xf0]  ;;  %v489_v23 = vld [vmem:[#allocation8 + $0x70] sm:$0xff]  ;;  %s641_s15 = smov [#allocation10]   ;;  %s356_s18 = sshll.u32 %s695_s5, 4  ;;  %s357_s18 = int_to_ptr.hbm [resolvable:$true] %s356_s18 }
  0x1a   :  { %v490_v17 = vld [vmem:[#allocation8 + $0x78] sm:$0xff]  ;;  %303 = vmatpush.bf16.msra.mxu2 %v482_v16  ;;  %v467_v24 = vld [vmem:[#allocation5 + $0x4] sm:$0xf]  ;;  %v372_v25 = vld [vmem:[#allocation5 + $0x8] sm:$0xf0]  ;;  %v371_v26 = vor.u32 %v468_v22, %v370_v21 }
  0x1b   :  { %146 = vmatpush.bf16.msra.mxu0 %v387_v10  ;;  %316 = vmatpush.bf16.msra.mxu3 %v490_v17  ;;  %v81_v27 = vld [vmem:[#allocation2] sm:$0xff]  ;;  %v480_v28 = vld [vmem:[#allocation8 + $0x28] sm:$0xff]  ;;  %v375_v29 = vor.u32 %v467_v24, %v372_v25  ;;  %v479_v32 = vld [vmem:[#allocation8 + $0x20] sm:$0xff] }
  0x1c   :  { %159 = vmatpush.bf16.msra.mxu1 %v391_v11  ;;  %v488_v30 = vld [vmem:[#allocation8 + $0x68] sm:$0xff]  ;;  %v82_v31 = vpack.c.bf16 %v81_v27, %v81_v27  ;;  %v487_v33 = vld [vmem:[#allocation8 + $0x60] sm:$0xff]  ;;  %v478_v34 = vld [vmem:[#allocation8 + $0x18] sm:$0xff] }
  0x1d   :  { %v486_v35 = vld [vmem:[#allocation8 + $0x58] sm:$0xff]  ;;  %v477_v36 = vld [vmem:[#allocation8 + $0x10] sm:$0xff]  ;;  %v476_v38 = vld [vmem:[#allocation8 + $0x8] sm:$0xff] }
  0x1e   :  { %304 = vmatpush.bf16.msra.mxu2 %v481_v19  ;;  %v485_v37 = vld [vmem:[#allocation8 + $0x50] sm:$0xff]  ;;  %v484_v39 = vld [vmem:[#allocation8 + $0x48] sm:$0xff]  ;;  %v475_v40 = vld [vmem:[#allocation8] sm:$0xff] }
  0x1f   :  { %147 = vmatpush.bf16.msra.mxu0 %v379_v18  ;;  %317 = vmatpush.bf16.msra.mxu3 %v489_v23  ;;  %v483_v41 = vld [vmem:[#allocation8 + $0x40] sm:$0xff]  ;;  %v91_v42 = vld [vmem:[#allocation7] sm:$0x3]  ;;  %v500_v55 = vld [vmem:[%s694_s4] ss:$0 sm:$0xff]  ;;  %s354_s4 = sshll.u32 %s641_s15, 4  ;;  %s355_s4 = int_to_ptr.vmem [resolvable:$true] %s354_s4 }
  0x20   :  { %160 = vmatpush.bf16.msra.mxu1 %v383_v20  ;;  %v93_v43 = vperm.slane %v91_v42, 0  ;;  %v94_v44 = vperm.slane %v91_v42, 1 }
  0x22   :  { %305 = vmatpush.bf16.msra.mxu2 %v480_v28 }
  0x23   :  { %148 = vmatpush.bf16.msra.mxu0 %v371_v26  ;;  %318 = vmatpush.bf16.msra.mxu3 %v488_v30 }
  0x24   :  { %161 = vmatpush.bf16.msra.mxu1 %v375_v29 }
  0x26   :  { %400 = vmatmul.msk.bf16.vlgmr.msra.gmra.mxu0 %vm137_vm0, %v82_v31  ;;  %306 = vmatpush.bf16.msra.mxu2 %v479_v32 }
  0x27   :  { %401 = vmatmul.msk.bf16.vlgmr.msra.gmra.mxu1 %vm137_vm0, %v82_v31  ;;  %319 = vmatpush.bf16.msra.mxu3 %v487_v33 }
  0x2a   :  { %307 = vmatpush.bf16.msra.mxu2 %v478_v34 }
  0x2b   :  { %320 = vmatpush.bf16.msra.mxu3 %v486_v35 }
  0x2e   :  { %308 = vmatpush.bf16.msra.mxu2 %v477_v36 }
  0x2f   :  { %321 = vmatpush.bf16.msra.mxu3 %v485_v37 }
  0x32   :  { %309 = vmatpush.bf16.msra.mxu2 %v476_v38 }
  0x33   :  { %322 = vmatpush.bf16.msra.mxu3 %v484_v39 }
  0x36   :  { %310 = vmatpush.bf16.msra.mxu2 %v475_v40 }
  0x37   :  { %323 = vmatpush.bf16.msra.mxu3 %v483_v41 }
  0xa3   :  { %v150_v45 = vpop.f32.mrf.mxu0 }
  0xa4   :  { %v151_v46 = vadd.f32 %v150_v45, %v93_v43  ;;  %v163_v47 = vpop.f32.mrf.mxu1 }
  0xa5   :  { %v164_v48 = vadd.f32 %v163_v47, %v94_v44 }
  0xa6   :  { %v167_v49 = vmax.f32 %v151_v46, 0.0 }
  0xa7   :  { %v168_v50 = vmax.f32 %v164_v48, 0.0 }
  0xa8   :  { %v169_v51 = vpack.c.bf16 %v167_v49, %v167_v49 }
  0xa9   :  { %v170_v52 = vpack.c.bf16 %v168_v50, %v168_v50 }
  0xaa   :  { %311 = vmatmul.bf16.vlgmr.msra.gmra.mxu2 %v169_v51 }
  0xab   :  { %324 = vmatmul.bf16.vlgmr.msra.gmra.mxu3 %v170_v52  ;;  %v152_v53 = vpop.f32.mrf.mxu0 }
  0xac   :  { %v165_v54 = vpop.f32.mrf.mxu1 }
 0x12d   :  { %v312_v56 = vpop.f32.mrf.mxu2 }
 0x12e   :  { %v313_v57 = vadd.f32 %v500_v55, %v312_v56  ;;  %v325_v58 = vpop.f32.mrf.mxu3 }
 0x130   :  { %v326_v59 = vadd.f32 %v325_v58, %v313_v57 }
 0x132   :  { %v466_v60 = vmul.f32 -1.442695, %v326_v59 }
 0x134   :  { %501 = vpow2.f32 %v466_v60 }
 0x135   :  { %v314_v61 = vpop.f32.mrf.mxu2 }
 0x136   :  { %v327_v62 = vpop.f32.mrf.mxu3 }
 0x13a   :  { %v502_v63 = vpop.eup %501 }
 0x13b   :  { %v332_v0 = vadd.f32 1.0, %v502_v63 }
 0x13d   :  { %503 = vrcp.f32 %v332_v0  ;;  %v344_v4 = vand.u32 2147483648, %v332_v0  ;;  %v342_v6 = vand.u32 2147483647, %v332_v0  ;;  %vm338_vm2 = vweird.f32 %v332_v0 }
 0x13f   :  { %v345_v8 = vor.u32 1.1754944e-38, %v344_v4  ;;  %vm343_vm4 = vcmp.eq.f32.partialorder %v342_v6, 8.507059e+37 }
 0x143   :  { %v504_v1 = vpop.eup %503 }
 0x144   :  { %v334_v2 = vmul.f32 %v504_v1, %v332_v0  ;;  %vm339_vm1 = vweird.f32 %v504_v1 }
 0x145   :  { %vm340_vm3 = vmor %vm338_vm2, %vm339_vm1 }
 0x146   :  { %v335_v3 = vsub.f32 1.0, %v334_v2 }
 0x148   :  { %v336_v5 = vmul.f32 %v504_v1, %v335_v3 }
 0x14a   :  { %v337_v7 = vadd.f32 %v504_v1, %v336_v5 }
 0x14c   :  { %v341_v9 = vsel %vm340_vm3, %v504_v1, %v337_v7 }
 0x14d   :  { %v346_v10 = vsel %vm343_vm4, %v345_v8, %v341_v9 }
 0x14e   :  { %348 = vst [vmem:[#allocation10] sm:$0xff] %v346_v10 }
 0x14f   :  { %359 = dma.vmem_to_hbm [thread:$0]  %s355_s4, 128, %s357_s18, [#allocation4]  }
 0x150   :  { %631 = dma.done.wait [#allocation4], 128  }
 0x151   :  { %632 = vsyncadd [#allocation4], 4294967168 }
 0x152   :  { %364 = vsyncpa [#allocation3], 1 }
 0x153   :  { %365 = vsyncpa [#allocation6], 1 }
 0x154   :  { %366 = vsyncpa [#allocation9], 1 }
 0x155   :  { %367 = vsyncpa [#allocation4], 1 }

</bundles_post_ra>
